<compile_context>
chip_gen: v6e
topology: v6e:2x2x1
jax: 0.10.0
libtpu: 0.0.40
codegen_flags: <defaults>
</compile_context>

<pallas_src>
import jax
import jax.numpy as jnp
import numpy as np
from jax.experimental import pallas as pl
from jax.experimental.pallas import tpu as pltpu


# ----------------------------- static helpers --------------------------------

def _interp_idx(l_in, l_out):
    """Nearest (floor) source indices used by F.interpolate(mode='nearest')."""
    return [(i * l_in) // l_out for i in range(l_out)]


# --------------------- wrapper-side weight refactoring ------------------------
# torch Conv1d weight (Cout, Cin, 3) is stored here as w[k] = (Cin, Cout) for
# tap k (0 = previous position, 1 = center, 2 = next).  Everything below runs
# once in the wrapper (plain XLA): pure layout / fixed linear combinations.

def _paired_pool_weight(w):
    """conv(k=3,'same') fused with the following max_pool1d(2).

    Returns (4*Cin, 2*Cout): the window [x[2j-1], x[2j], x[2j+1], x[2j+2]]
    produces output position 2j in cols [:Cout] and 2j+1 in cols [Cout:] from
    a single matmul; the caller max-reduces the two halves.
    """
    _, cin, cout = w.shape
    wf = w.reshape(3 * cin, cout)
    wp = jnp.zeros((4 * cin, 2 * cout), w.dtype)
    wp = wp.at[0:3 * cin, :cout].set(wf)      # even output: taps on rows 0..2
    wp = wp.at[cin:4 * cin, cout:].set(wf)    # odd  output: taps on rows 1..3
    return wp


def _conv3_weight(w):
    """conv3 on its fixed length-2 input -> one (2*Cin, 2*Cout) matmul."""
    _, cin, cout = w.shape
    wc = jnp.zeros((2 * cin, 2 * cout), w.dtype)
    wc = wc.at[0:cin, :cout].set(w[1])        # z0 = g0 @ w1 + g1 @ w2
    wc = wc.at[cin:, :cout].set(w[2])
    wc = wc.at[0:cin, cout:].set(w[0])        # z1 = g0 @ w0 + g1 @ w1
    wc = wc.at[cin:, cout:].set(w[1])
    return wc


def _conv4_weight(w):
    """conv4 on the fixed F.interpolate(_,4) pattern [z0,z0,z1,z1]
    -> one (2*Cin, 4*Cout) matmul; its output is the final lane-flat slab."""
    _, cin, cout = w.shape
    u0, u1, u2 = w[0], w[1], w[2]
    wc = jnp.zeros((2 * cin, 4 * cout), w.dtype)
    wc = wc.at[0:cin, 0 * cout:1 * cout].set(u1 + u2)   # y0 = z0@(u1+u2)
    wc = wc.at[0:cin, 1 * cout:2 * cout].set(u0 + u1)   # y1 = z0@(u0+u1)+z1@u2
    wc = wc.at[cin:, 1 * cout:2 * cout].set(u2)
    wc = wc.at[0:cin, 2 * cout:3 * cout].set(u0)        # y2 = z0@u0+z1@(u1+u2)
    wc = wc.at[cin:, 2 * cout:3 * cout].set(u1 + u2)
    wc = wc.at[cin:, 3 * cout:4 * cout].set(u0 + u1)    # y3 = z1@(u0+u1)
    return wc


# --------------------------------- kernel ------------------------------------

def _net_kernel(x_ref, w1p_ref, b1_ref, w2p_ref, b2_ref,
                w3c_ref, b3_ref, w4c_ref, b4_ref, out_ref):
    cin = w1p_ref.shape[0] // 4          # input_dim
    nf = w1p_ref.shape[1] // 2
    bottle = w2p_ref.shape[1] // 2
    seq = x_ref.shape[1] // cin
    L2 = seq // 2                        # length after pool1
    L3 = seq // 4                        # length after pool2

    x = x_ref[...].astype(jnp.float32)   # (Bt, seq*cin) lane-flat
    w1p = w1p_ref[...]
    w2p = w2p_ref[...]
    b1 = b1_ref[...]
    b2 = b2_ref[...]

    # F.interpolate(_, 2) selects these pooled-2 positions ...
    bidx = _interp_idx(L3, 2)
    need2 = sorted(set(bidx))
    # ... which only need these pooled-1 positions (conv2 k=3 windows).
    need1 = sorted({p for i in need2
                    for p in range(max(2 * i - 1, 0),
                                   min(2 * i + 2, L2 - 1) + 1)})

    # conv1 + relu + max_pool1d(2): one matmul per needed pooled position.
    # Window = contiguous lane slice of x; both pool halves come out in N.
    h = {}
    for j in need1:
        lo = max(2 * j - 1, 0)
        hi = min(2 * j + 2, seq - 1)
        win = x[:, lo * cin:(hi + 1) * cin]
        w = w1p[(lo - (2 * j - 1)) * cin:(hi - (2 * j - 1) + 1) * cin]
        y = jnp.dot(win, w, preferred_element_type=jnp.float32)   # (Bt, 2*nf)
        h[j] = jnp.maximum(jnp.maximum(y[:, :nf], y[:, nf:]) + b1, 0.0)

    # conv2 + relu + max_pool1d(2): one matmul per surviving pooled position.
    # Window = concat of 128-lane-aligned slabs; pool halves come out in N.
    g = {}
    for i in need2:
        lo = max(2 * i - 1, 0)
        hi = min(2 * i + 2, L2 - 1)
        win = jnp.concatenate([h[p] for p in range(lo, hi + 1)], axis=1)
        w = w2p[(lo - (2 * i - 1)) * nf:(hi - (2 * i - 1) + 1) * nf]
        y = jnp.dot(win, w, preferred_element_type=jnp.float32)   # (Bt, 2*bottle)
        g[i] = jnp.maximum(jnp.maximum(y[:, :bottle], y[:, bottle:]) + b2, 0.0)

    # F.interpolate(_, 2) -> conv3 + relu: single matmul, lane-dense (Bt, 2*nf).
    gcat = jnp.concatenate([g[bidx[0]], g[bidx[1]]], axis=1)
    z = jnp.maximum(
        jnp.dot(gcat, w3c_ref[...], preferred_element_type=jnp.float32)
        + b3_ref[...], 0.0)

    # F.interpolate(_, 4) -> conv4: single matmul whose result is already the
    # lane-dense (Bt, 4*cin) output slab.
    out = (jnp.dot(z, w4c_ref[...], preferred_element_type=jnp.float32)
           + b4_ref[...])
    out_ref[...] = out.astype(out_ref.dtype)


# --------------------------------- wrapper -----------------------------------

def neural_network3_forward(x, params, *, block_b=None):
    """x: (B, seq, input_dim).  Returns (B, 4, input_dim)."""
    B, seq, input_dim = x.shape
    assert seq % 4 == 0, "seq must be divisible by 4 (two max-pools of 2)"
    w1, b1, w2, b2, w3, b3, w4, b4 = params

    # one-time weight refactoring (layout + fixed linear combinations)
    w1p = _paired_pool_weight(w1)                 # (4*input_dim, 2*nf)
    w2p = _paired_pool_weight(w2)                 # (4*nf, 2*bottle)
    w3c = _conv3_weight(w3)                       # (2*bottle, 2*nf)
    w4c = _conv4_weight(w4)                       # (2*nf, 4*input_dim)
    b3t = jnp.concatenate([b3, b3], axis=1)       # (1, 2*nf)
    b4t = jnp.concatenate([b4] * 4, axis=1)       # (1, 4*input_dim)

    x2d = x.reshape(B, seq * input_dim)           # lane-flat input slab

    if block_b is None:
        bt = B if B <= 512 else 512               # multiple of 8; >=2 blocks for big B
    else:
        bt = block_b
    nblocks = pl.cdiv(B, bt)

    def _full(shape):
        n = len(shape)
        return pl.BlockSpec(shape, lambda i, _n=n: (0,) * _n)

    grid_spec = pltpu.PrefetchScalarGridSpec(
        num_scalar_prefetch=0,
        grid=(nblocks,),
        in_specs=[
            pl.BlockSpec((bt, seq * input_dim), lambda i: (i, 0)),
            _full(w1p.shape), _full(b1.shape),
            _full(w2p.shape), _full(b2.shape),
            _full(w3c.shape), _full(b3t.shape),
            _full(w4c.shape), _full(b4t.shape),
        ],
        out_specs=pl.BlockSpec((bt, 4 * input_dim), lambda i: (i, 0)),
    )
    out2d = pl.pallas_call(
        _net_kernel,
        out_shape=jax.ShapeDtypeStruct((B, 4 * input_dim), x.dtype),
        grid_spec=grid_spec,
        compiler_params=pltpu.CompilerParams(
            dimension_semantics=("parallel",)),
    )(x2d, w1p, b1, w2p, b2, w3c, b3t, w4c, b4t)
    return out2d.reshape(B, 4, input_dim)


# ----------------------- deterministic parameter init ------------------------

def init_params(key, input_dim, bottle_dim, nf):
    ks = jax.random.split(key, 8)

    def conv_params(kw, kb, cin, cout):
        # stored as (K=3, Cin, Cout) == torch weight (Cout, Cin, K) transposed
        w = 0.1 * jax.random.normal(kw, (3, cin, cout), jnp.float32)
        b = 0.1 * jax.random.normal(kb, (1, cout), jnp.float32)
        return w, b

    w1, b1 = conv_params(ks[0], ks[1], input_dim, nf)
    w2, b2 = conv_params(ks[2], ks[3], nf, bottle_dim)
    w3, b3 = conv_params(ks[4], ks[5], bottle_dim, nf)
    w4, b4 = conv_params(ks[6], ks[7], nf, input_dim)
    return (w1, b1, w2, b2, w3, b3, w4, b4)


# --------------------------- pure-JAX reference -------------------------------

def reference_forward(x, params):
    w1, b1, w2, b2, w3, b3, w4, b4 = params

    def conv(x, w, b):  # x: (B, L, Cin)
        L = x.shape[1]
        xp = jnp.pad(x, ((0, 0), (1, 1), (0, 0)))
        y = (jnp.einsum("blc,cd->bld", xp[:, 0:L], w[0])
             + jnp.einsum("blc,cd->bld", xp[:, 1:L + 1], w[1])
             + jnp.einsum("blc,cd->bld", xp[:, 2:L + 2], w[2]))
        return y + b

    def pool(x):
        return jnp.maximum(x[:, 0::2], x[:, 1::2])

    def interp(x, out_len):
        L = x.shape[1]
        idx = jnp.array([(i * L) // out_len for i in range(out_len)])
        return x[:, idx, :]

    h = jax.nn.relu(conv(x, w1, b1))
    h = pool(h)
    h = jax.nn.relu(conv(h, w2, b2))
    h = pool(h)
    h = interp(h, 2)
    h = jax.nn.relu(conv(h, w3, b3))
    h = interp(h, 4)
    return conv(h, w4, b4)


# ----------------------------------- main -------------------------------------

if __name__ == "__main__":
    key = jax.random.PRNGKey(0)
    kx, kp, kx2, kx3 = jax.random.split(key, 4)

    # small config implied by the module: batch=2, seq=8, input_dim=4,
    # bottle_dim=8, nf=128
    B, seq, input_dim, bottle_dim, nf = 2, 8, 4, 8, 128
    params = init_params(kp, input_dim, bottle_dim, nf)

    x = jax.random.normal(kx, (B, seq, input_dim), jnp.float32)
    out = jax.block_until_ready(neural_network3_forward(x, params))
    assert out.shape == (B, 4, input_dim), out.shape
    np.testing.assert_allclose(np.asarray(out),
                               np.asarray(reference_forward(x, params)),
                               rtol=1e-3, atol=1e-3)

    # batch-blocked (multi grid step) path
    x2 = jax.random.normal(kx2, (48, seq, input_dim), jnp.float32)
    out2 = jax.block_until_ready(
        neural_network3_forward(x2, params, block_b=16))
    np.testing.assert_allclose(np.asarray(out2),
                               np.asarray(reference_forward(x2, params)),
                               rtol=1e-3, atol=1e-3)

    # longer sequence: exercises interp-selection / skipped-position path
    x3 = jax.random.normal(kx3, (8, 16, input_dim), jnp.float32)
    out3 = jax.block_until_ready(neural_network3_forward(x3, params))
    np.testing.assert_allclose(np.asarray(out3),
                               np.asarray(reference_forward(x3, params)),
                               rtol=1e-3, atol=1e-3)

    print("KERNEL_OK")
</pallas_src>

<mosaic_0001>
module attributes {stable_mosaic.version = 11 : i64} {
  func.func @_net_kernel(%arg0: i32, %arg1: memref<2x32xf32, #tpu.memory_space<vmem>>, %arg2: memref<16x256xf32, #tpu.memory_space<vmem>>, %arg3: memref<1x128xf32, #tpu.memory_space<vmem>>, %arg4: memref<512x16xf32, #tpu.memory_space<vmem>>, %arg5: memref<1x8xf32, #tpu.memory_space<vmem>>, %arg6: memref<16x256xf32, #tpu.memory_space<vmem>>, %arg7: memref<1x256xf32, #tpu.memory_space<vmem>>, %arg8: memref<256x16xf32, #tpu.memory_space<vmem>>, %arg9: memref<1x16xf32, #tpu.memory_space<vmem>>, %arg10: memref<2x16xf32, #tpu.memory_space<vmem>>) attributes {dimension_semantics = [#tpu.dimension_semantics<parallel>], iteration_bounds = array<i64: 1>, scalar_prefetch = 0 : i64, scratch_operands = 0 : i64, tpu.core_type = #tpu.core_type<tc>, window_params = [{transform_indices = @transform_0, window_bounds = array<i64: 2, 32>}, {pipeline_mode = #tpu.pipeline_mode<synchronous>, transform_indices = @transform_1, window_bounds = array<i64: 16, 256>}, {pipeline_mode = #tpu.pipeline_mode<synchronous>, transform_indices = @transform_2, window_bounds = array<i64: 1, 128>}, {pipeline_mode = #tpu.pipeline_mode<synchronous>, transform_indices = @transform_3, window_bounds = array<i64: 512, 16>}, {pipeline_mode = #tpu.pipeline_mode<synchronous>, transform_indices = @transform_4, window_bounds = array<i64: 1, 8>}, {pipeline_mode = #tpu.pipeline_mode<synchronous>, transform_indices = @transform_5, window_bounds = array<i64: 16, 256>}, {pipeline_mode = #tpu.pipeline_mode<synchronous>, transform_indices = @transform_6, window_bounds = array<i64: 1, 256>}, {pipeline_mode = #tpu.pipeline_mode<synchronous>, transform_indices = @transform_7, window_bounds = array<i64: 256, 16>}, {pipeline_mode = #tpu.pipeline_mode<synchronous>, transform_indices = @transform_8, window_bounds = array<i64: 1, 16>}, {transform_indices = @transform_9, window_bounds = array<i64: 2, 16>}]} {
    %c0 = arith.constant 0 : index
    %c0_0 = arith.constant 0 : index
    %0 = vector.load %arg1[%c0, %c0_0] : memref<2x32xf32, #tpu.memory_space<vmem>>, vector<2x32xf32>
    %c0_1 = arith.constant 0 : index
    %c0_2 = arith.constant 0 : index
    %1 = vector.load %arg2[%c0_1, %c0_2] : memref<16x256xf32, #tpu.memory_space<vmem>>, vector<16x256xf32>
    %c0_3 = arith.constant 0 : index
    %c0_4 = arith.constant 0 : index
    %2 = vector.load %arg4[%c0_3, %c0_4] : memref<512x16xf32, #tpu.memory_space<vmem>>, vector<512x16xf32>
    %c0_5 = arith.constant 0 : index
    %c0_6 = arith.constant 0 : index
    %3 = vector.load %arg3[%c0_5, %c0_6] : memref<1x128xf32, #tpu.memory_space<vmem>>, vector<1x128xf32>
    %c0_7 = arith.constant 0 : index
    %c0_8 = arith.constant 0 : index
    %4 = vector.load %arg5[%c0_7, %c0_8] : memref<1x8xf32, #tpu.memory_space<vmem>>, vector<1x8xf32>
    %5 = vector.extract_strided_slice %0 {offsets = [0, 0], sizes = [2, 12], strides = [1, 1]} : vector<2x32xf32> to vector<2x12xf32>
    %6 = vector.extract_strided_slice %1 {offsets = [4, 0], sizes = [12, 256], strides = [1, 1]} : vector<16x256xf32> to vector<12x256xf32>
    %cst = arith.constant dense<0.000000e+00> : vector<2x256xf32>
    %7 = tpu.matmul %5, %6, %cst {dimension_numbers = #tpu.dot_dimension_numbers<[1], [0], [0], [1], [0, 0, 1, 1], [], []>} : vector<2x12xf32>, vector<12x256xf32>, vector<2x256xf32> -> vector<2x256xf32>
    %8 = vector.extract_strided_slice %7 {offsets = [0, 0], sizes = [2, 128], strides = [1, 1]} : vector<2x256xf32> to vector<2x128xf32>
    %9 = vector.extract_strided_slice %7 {offsets = [0, 128], sizes = [2, 128], strides = [1, 1]} : vector<2x256xf32> to vector<2x128xf32>
    %10 = arith.maximumf %8, %9 : vector<2x128xf32>
    %11 = vector.broadcast %3 : vector<1x128xf32> to vector<2x128xf32>
    %12 = arith.addf %10, %11 : vector<2x128xf32>
    %cst_9 = arith.constant 0.000000e+00 : f32
    %13 = vector.broadcast %cst_9 : f32 to vector<2x128xf32>
    %14 = arith.maximumf %12, %13 : vector<2x128xf32>
    %15 = vector.extract_strided_slice %0 {offsets = [0, 4], sizes = [2, 16], strides = [1, 1]} : vector<2x32xf32> to vector<2x16xf32>
    %cst_10 = arith.constant dense<0.000000e+00> : vector<2x256xf32>
    %16 = tpu.matmul %15, %1, %cst_10 {dimension_numbers = #tpu.dot_dimension_numbers<[1], [0], [0], [1], [0, 0, 1, 1], [], []>} : vector<2x16xf32>, vector<16x256xf32>, vector<2x256xf32> -> vector<2x256xf32>
    %17 = vector.extract_strided_slice %16 {offsets = [0, 0], sizes = [2, 128], strides = [1, 1]} : vector<2x256xf32> to vector<2x128xf32>
    %18 = vector.extract_strided_slice %16 {offsets = [0, 128], sizes = [2, 128], strides = [1, 1]} : vector<2x256xf32> to vector<2x128xf32>
    %19 = arith.maximumf %17, %18 : vector<2x128xf32>
    %20 = vector.broadcast %3 : vector<1x128xf32> to vector<2x128xf32>
    %21 = arith.addf %19, %20 : vector<2x128xf32>
    %cst_11 = arith.constant 0.000000e+00 : f32
    %22 = vector.broadcast %cst_11 : f32 to vector<2x128xf32>
    %23 = arith.maximumf %21, %22 : vector<2x128xf32>
    %24 = vector.extract_strided_slice %0 {offsets = [0, 12], sizes = [2, 16], strides = [1, 1]} : vector<2x32xf32> to vector<2x16xf32>
    %cst_12 = arith.constant dense<0.000000e+00> : vector<2x256xf32>
    %25 = tpu.matmul %24, %1, %cst_12 {dimension_numbers = #tpu.dot_dimension_numbers<[1], [0], [0], [1], [0, 0, 1, 1], [], []>} : vector<2x16xf32>, vector<16x256xf32>, vector<2x256xf32> -> vector<2x256xf32>
    %26 = vector.extract_strided_slice %25 {offsets = [0, 0], sizes = [2, 128], strides = [1, 1]} : vector<2x256xf32> to vector<2x128xf32>
    %27 = vector.extract_strided_slice %25 {offsets = [0, 128], sizes = [2, 128], strides = [1, 1]} : vector<2x256xf32> to vector<2x128xf32>
    %28 = arith.maximumf %26, %27 : vector<2x128xf32>
    %29 = vector.broadcast %3 : vector<1x128xf32> to vector<2x128xf32>
    %30 = arith.addf %28, %29 : vector<2x128xf32>
    %cst_13 = arith.constant 0.000000e+00 : f32
    %31 = vector.broadcast %cst_13 : f32 to vector<2x128xf32>
    %32 = arith.maximumf %30, %31 : vector<2x128xf32>
    %33 = vector.extract_strided_slice %0 {offsets = [0, 20], sizes = [2, 12], strides = [1, 1]} : vector<2x32xf32> to vector<2x12xf32>
    %34 = vector.extract_strided_slice %1 {offsets = [0, 0], sizes = [12, 256], strides = [1, 1]} : vector<16x256xf32> to vector<12x256xf32>
    %cst_14 = arith.constant dense<0.000000e+00> : vector<2x256xf32>
    %35 = tpu.matmul %33, %34, %cst_14 {dimension_numbers = #tpu.dot_dimension_numbers<[1], [0], [0], [1], [0, 0, 1, 1], [], []>} : vector<2x12xf32>, vector<12x256xf32>, vector<2x256xf32> -> vector<2x256xf32>
    %36 = vector.extract_strided_slice %35 {offsets = [0, 0], sizes = [2, 128], strides = [1, 1]} : vector<2x256xf32> to vector<2x128xf32>
    %37 = vector.extract_strided_slice %35 {offsets = [0, 128], sizes = [2, 128], strides = [1, 1]} : vector<2x256xf32> to vector<2x128xf32>
    %38 = arith.maximumf %36, %37 : vector<2x128xf32>
    %39 = vector.broadcast %3 : vector<1x128xf32> to vector<2x128xf32>
    %40 = arith.addf %38, %39 : vector<2x128xf32>
    %cst_15 = arith.constant 0.000000e+00 : f32
    %41 = vector.broadcast %cst_15 : f32 to vector<2x128xf32>
    %42 = arith.maximumf %40, %41 : vector<2x128xf32>
    %43 = tpu.concatenate %14, %23, %32 in 1 : vector<2x128xf32>, vector<2x128xf32>, vector<2x128xf32> -> vector<2x384xf32>
    %44 = vector.extract_strided_slice %2 {offsets = [128, 0], sizes = [384, 16], strides = [1, 1]} : vector<512x16xf32> to vector<384x16xf32>
    %cst_16 = arith.constant dense<0.000000e+00> : vector<2x16xf32>
    %45 = tpu.matmul %43, %44, %cst_16 {dimension_numbers = #tpu.dot_dimension_numbers<[1], [0], [0], [1], [0, 0, 1, 1], [], []>} : vector<2x384xf32>, vector<384x16xf32>, vector<2x16xf32> -> vector<2x16xf32>
    %46 = vector.extract_strided_slice %45 {offsets = [0, 0], sizes = [2, 8], strides = [1, 1]} : vector<2x16xf32> to vector<2x8xf32>
    %47 = vector.extract_strided_slice %45 {offsets = [0, 8], sizes = [2, 8], strides = [1, 1]} : vector<2x16xf32> to vector<2x8xf32>
    %48 = arith.maximumf %46, %47 : vector<2x8xf32>
    %49 = vector.broadcast %4 : vector<1x8xf32> to vector<2x8xf32>
    %50 = arith.addf %48, %49 : vector<2x8xf32>
    %cst_17 = arith.constant 0.000000e+00 : f32
    %51 = vector.broadcast %cst_17 : f32 to vector<2x8xf32>
    %52 = arith.maximumf %50, %51 : vector<2x8xf32>
    %53 = tpu.concatenate %23, %32, %42 in 1 : vector<2x128xf32>, vector<2x128xf32>, vector<2x128xf32> -> vector<2x384xf32>
    %54 = vector.extract_strided_slice %2 {offsets = [0, 0], sizes = [384, 16], strides = [1, 1]} : vector<512x16xf32> to vector<384x16xf32>
    %cst_18 = arith.constant dense<0.000000e+00> : vector<2x16xf32>
    %55 = tpu.matmul %53, %54, %cst_18 {dimension_numbers = #tpu.dot_dimension_numbers<[1], [0], [0], [1], [0, 0, 1, 1], [], []>} : vector<2x384xf32>, vector<384x16xf32>, vector<2x16xf32> -> vector<2x16xf32>
    %56 = vector.extract_strided_slice %55 {offsets = [0, 0], sizes = [2, 8], strides = [1, 1]} : vector<2x16xf32> to vector<2x8xf32>
    %57 = vector.extract_strided_slice %55 {offsets = [0, 8], sizes = [2, 8], strides = [1, 1]} : vector<2x16xf32> to vector<2x8xf32>
    %58 = arith.maximumf %56, %57 : vector<2x8xf32>
    %59 = vector.broadcast %4 : vector<1x8xf32> to vector<2x8xf32>
    %60 = arith.addf %58, %59 : vector<2x8xf32>
    %cst_19 = arith.constant 0.000000e+00 : f32
    %61 = vector.broadcast %cst_19 : f32 to vector<2x8xf32>
    %62 = arith.maximumf %60, %61 : vector<2x8xf32>
    %63 = tpu.concatenate %52, %62 in 1 : vector<2x8xf32>, vector<2x8xf32> -> vector<2x16xf32>
    %c0_20 = arith.constant 0 : index
    %c0_21 = arith.constant 0 : index
    %64 = vector.load %arg6[%c0_20, %c0_21] : memref<16x256xf32, #tpu.memory_space<vmem>>, vector<16x256xf32>
    %cst_22 = arith.constant dense<0.000000e+00> : vector<2x256xf32>
    %65 = tpu.matmul %63, %64, %cst_22 {dimension_numbers = #tpu.dot_dimension_numbers<[1], [0], [0], [1], [0, 0, 1, 1], [], []>} : vector<2x16xf32>, vector<16x256xf32>, vector<2x256xf32> -> vector<2x256xf32>
    %c0_23 = arith.constant 0 : index
    %c0_24 = arith.constant 0 : index
    %66 = vector.load %arg7[%c0_23, %c0_24] : memref<1x256xf32, #tpu.memory_space<vmem>>, vector<1x256xf32>
    %67 = vector.broadcast %66 : vector<1x256xf32> to vector<2x256xf32>
    %68 = arith.addf %65, %67 : vector<2x256xf32>
    %cst_25 = arith.constant 0.000000e+00 : f32
    %69 = vector.broadcast %cst_25 : f32 to vector<2x256xf32>
    %70 = arith.maximumf %68, %69 : vector<2x256xf32>
    %c0_26 = arith.constant 0 : index
    %c0_27 = arith.constant 0 : index
    %71 = vector.load %arg8[%c0_26, %c0_27] : memref<256x16xf32, #tpu.memory_space<vmem>>, vector<256x16xf32>
    %cst_28 = arith.constant dense<0.000000e+00> : vector<2x16xf32>
    %72 = tpu.matmul %70, %71, %cst_28 {dimension_numbers = #tpu.dot_dimension_numbers<[1], [0], [0], [1], [0, 0, 1, 1], [], []>} : vector<2x256xf32>, vector<256x16xf32>, vector<2x16xf32> -> vector<2x16xf32>
    %c0_29 = arith.constant 0 : index
    %c0_30 = arith.constant 0 : index
    %73 = vector.load %arg9[%c0_29, %c0_30] : memref<1x16xf32, #tpu.memory_space<vmem>>, vector<1x16xf32>
    %74 = vector.broadcast %73 : vector<1x16xf32> to vector<2x16xf32>
    %75 = arith.addf %72, %74 : vector<2x16xf32>
    %c0_31 = arith.constant 0 : index
    %c0_32 = arith.constant 0 : index
    %76 = vector.load %arg10[%c0_31, %c0_32] : memref<2x16xf32, #tpu.memory_space<vmem>>, vector<2x16xf32>
    tpu.vector_store %arg10[%c0_31, %c0_32], %75 {strides = array<i32>} : memref<2x16xf32, #tpu.memory_space<vmem>>, vector<2x16xf32>,
    return
  }
  func.func @transform_0(%arg0: i32) -> (i32, i32) {
    %c0_i32 = arith.constant 0 : i32
    %c0_i32_0 = arith.constant 0 : i32
    return %arg0, %c0_i32 : i32, i32
  }
  func.func @transform_1(%arg0: i32) -> (i32, i32) {
    %c0_i32 = arith.constant 0 : i32
    %c0_i32_0 = arith.constant 0 : i32
    %c0_i32_1 = arith.constant 0 : i32
    return %c0_i32, %c0_i32_0 : i32, i32
  }
  func.func @transform_2(%arg0: i32) -> (i32, i32) {
    %c0_i32 = arith.constant 0 : i32
    %c0_i32_0 = arith.constant 0 : i32
    %c0_i32_1 = arith.constant 0 : i32
    return %c0_i32, %c0_i32_0 : i32, i32
  }
  func.func @transform_3(%arg0: i32) -> (i32, i32) {
    %c0_i32 = arith.constant 0 : i32
    %c0_i32_0 = arith.constant 0 : i32
    %c0_i32_1 = arith.constant 0 : i32
    return %c0_i32, %c0_i32_0 : i32, i32
  }
  func.func @transform_4(%arg0: i32) -> (i32, i32) {
    %c0_i32 = arith.constant 0 : i32
    %c0_i32_0 = arith.constant 0 : i32
    %c0_i32_1 = arith.constant 0 : i32
    return %c0_i32, %c0_i32_0 : i32, i32
  }
  func.func @transform_5(%arg0: i32) -> (i32, i32) {
    %c0_i32 = arith.constant 0 : i32
    %c0_i32_0 = arith.constant 0 : i32
    %c0_i32_1 = arith.constant 0 : i32
    return %c0_i32, %c0_i32_0 : i32, i32
  }
  func.func @transform_6(%arg0: i32) -> (i32, i32) {
    %c0_i32 = arith.constant 0 : i32
    %c0_i32_0 = arith.constant 0 : i32
    %c0_i32_1 = arith.constant 0 : i32
    return %c0_i32, %c0_i32_0 : i32, i32
  }
  func.func @transform_7(%arg0: i32) -> (i32, i32) {
    %c0_i32 = arith.constant 0 : i32
    %c0_i32_0 = arith.constant 0 : i32
    %c0_i32_1 = arith.constant 0 : i32
    return %c0_i32, %c0_i32_0 : i32, i32
  }
  func.func @transform_8(%arg0: i32) -> (i32, i32) {
    %c0_i32 = arith.constant 0 : i32
    %c0_i32_0 = arith.constant 0 : i32
    %c0_i32_1 = arith.constant 0 : i32
    return %c0_i32, %c0_i32_0 : i32, i32
  }
  func.func @transform_9(%arg0: i32) -> (i32, i32) {
    %c0_i32 = arith.constant 0 : i32
    %c0_i32_0 = arith.constant 0 : i32
    return %arg0, %c0_i32 : i32, i32
  }
}

</mosaic_0001>

<bundles_post_ra>
// kernel: tpu_custom_call.1
= control target key start
LH: loop header
LB: loop body
LE: loop exit
PB: predicated region body
PF: predicated region fallthrough
CT: control target
= control target key end

     0   :  { %vm108_vm0 = vcmask 1043456   ;;  %s1218_s13 = smov 124   ;;  %s1219_s19 = smov 108   ;;  %v1220_v9 = vmov 0.0   ;;  %vm117_vm1 = vcmask 97280   ;;  %s1827_s0 = inlined_call_operand.vmem [shape: f32[2,32], index: 0, kind: input, shape index: {}]   ;;  %s1828_s1 = inlined_call_operand.vmem [shape: f32[16,256], index: 1, kind: input, shape index: {}]   ;;  %s1829_s2 = inlined_call_operand.vmem [shape: f32[1,128], index: 2, kind: input, shape index: {}]   ;;  %s1830_s3 = inlined_call_operand.vmem [shape: f32[512,16], index: 3, kind: input, shape index: {}]   ;;  %s1831_s4 = inlined_call_operand.vmem [shape: f32[1,8], index: 4, kind: input, shape index: {}]   ;;  %s1832_s5 = inlined_call_operand.vmem [shape: f32[16,256], index: 5, kind: input, shape index: {}]   ;;  %s1833_s6 = inlined_call_operand.vmem [shape: f32[1,256], index: 6, kind: input, shape index: {}]   ;;  %s1834_s7 = inlined_call_operand.vmem [shape: f32[256,16], index: 7, kind: input, shape index: {}]   ;;  %s1835_s8 = inlined_call_operand.vmem [shape: f32[1,16], index: 8, kind: input, shape index: {}]   ;;  %s1836_s9 = inlined_call_operand.hbm [shape: f32[2,16], index: 9, kind: output, shape index: {}]  }
   0x1   :  { %v33_v0 = vld [vmem:[%s1827_s0] sm:$0x3]  ;;  %v1282_v1 = vld [vmem:[%s1828_s1 + $0x18] sm:$0xff]  ;;  %v1288_v3 = vld [vmem:[%s1828_s1 + $0x10] sm:$0xff]  ;;  %189 = vmatprep.mubr.f32.mxu0 %v1220_v9  ;;  %1118 = vmatprep.subr.mxu1 %v1220_v9  ;;  %s1221_s21 = smov 116  }
   0x2   :  { %205 = vrot.lane.b32.xlu0 %v33_v0, %s1218_s13  ;;  %v113_v2 = vrot.slane %v1282_v1, 4  ;;  %v1293_v4 = vld [vmem:[%s1828_s1 + $0x8] sm:$0xff]  ;;  %v1298_v5 = vld [vmem:[%s1828_s1] sm:$0xff]  ;;  %362 = vrot.lane.b32.xlu1 %v33_v0, %s1219_s19  ;;  %v110_v6 = vrot.slane %v1288_v3, 4 }
   0x3   :  { %v112_v7 = vrot.slane %v1293_v4, 4  ;;  %v109_v8 = vrot.slane %v1298_v5, 4  ;;  %v101_v12 = vld [vmem:[%s1830_s3 + $0x1f8] sm:$0xff]  ;;  %v100_v13 = vld [vmem:[%s1830_s3 + $0x1f0] sm:$0xff] }
   0x4   :  { %967 = vmatprep.subr.msk.mxu0 %vm108_vm0, %v113_v2  ;;  %1119 = vmatpush3.msra.mxu1 %v101_v12 }
   0x5   :  { %968 = vmatpush1.msk.msra.mxu0 %vm108_vm0, %v110_v6  ;;  %v114_v10 = vsel %vm108_vm0, %v112_v7, %v113_v2  ;;  %v111_v11 = vsel %vm108_vm0, %v109_v8, %v110_v6 }
   0x6   :  { %284 = vrot.lane.b32.xlu0 %v33_v0, %s1221_s21  ;;  %155 = vmatprep.subr.mxu0 %v114_v10 }
   0x7   :  { %156 = vmatpush1.msra.mxu0 %v111_v11 }
   0x8   :  { %969 = vmatmul.mubr.msk.f32.vlgmr.msra.gmra.mxu0 %vm117_vm1, %v33_v0  ;;  %238 = vmatprep.subr.mxu0 %v1282_v1 }
   0x9   :  { %239 = vmatpush1.msra.mxu0 %v1288_v3  ;;  %274 = vmatprep.mubr.f32.mxu0 %v1220_v9 }
   0xa   :  { %14 = vsyncpa [#allocation3], 0  ;;  %240 = vmatprep.subr.mxu0 %v1293_v4  ;;  %1120 = vmatprep.subr.mxu1 %v1220_v9  ;;  %v99_v14 = vld [vmem:[%s1830_s3 + $0x1e8] sm:$0xff]  ;;  %v98_v15 = vld [vmem:[%s1830_s3 + $0x1e0] sm:$0xff]  ;;  %vm207_vm2 = vcmask 130048   ;;  %vm1222_vm3 = vmmov 0  }
   0xb   :  { %241 = vmatpush1.msra.mxu0 %v1298_v5  ;;  %1121 = vmatpush3.msra.mxu1 %v100_v13  ;;  %v97_v16 = vld [vmem:[%s1830_s3 + $0x1d8] sm:$0xff]  ;;  %v96_v17 = vld [vmem:[%s1830_s3 + $0x1d0] sm:$0xff]  ;;  %v95_v18 = vld [vmem:[%s1830_s3 + $0x1c8] sm:$0xff]  ;;  %s1224_s21 = smov 8   ;;  %vm748_vm4 = vcmask 64512   ;;  %s1225_s11 = smov [#allocation2]  }
   0xc   :  { %316 = vmatprep.subr.mxu0 %v1282_v1  ;;  %1122 = vmatprep.subr.mxu1 %v1220_v9  ;;  %v94_v19 = vld [vmem:[%s1830_s3 + $0x1c0] sm:$0xff]  ;;  %v93_v20 = vld [vmem:[%s1830_s3 + $0x1b8] sm:$0xff]  ;;  %v92_v21 = vld [vmem:[%s1830_s3 + $0x1b0] sm:$0xff]  ;;  %vm951_vm5 = vcmask 123904  }
   0xd   :  { %1123 = vmatpush3.msra.mxu1 %v99_v14  ;;  %v1370_v25 = vld [vmem:[%s1830_s3 + $0x178] sm:$0xff]  ;;  %v1382_v27 = vld [vmem:[%s1830_s3 + $0x170] sm:$0xff]  ;;  %v1395_v29 = vld [vmem:[%s1830_s3 + $0x168] sm:$0xff]  ;;  %1150 = vmatprep.mubr.msk.f32.mxu1 %vm1222_vm3, %v1220_v9 }
   0xe   :  { %1124 = vmatprep.subr.mxu1 %v1220_v9  ;;  %v1376_v26 = vld [vmem:[%s1830_s3 + $0xf8] sm:$0xff]  ;;  %v1389_v28 = vld [vmem:[%s1830_s3 + $0xf0] sm:$0xff]  ;;  %v1401_v30 = vld [vmem:[%s1830_s3 + $0xe8] sm:$0xff] }
   0xf   :  { %1125 = vmatpush3.msra.mxu1 %v98_v15  ;;  %v1407_v31 = vld [vmem:[%s1830_s3 + $0x160] sm:$0xff]  ;;  %v1419_v33 = vld [vmem:[%s1830_s3 + $0x158] sm:$0xff]  ;;  %v1431_v35 = vld [vmem:[%s1830_s3 + $0x150] sm:$0xff] }
  0x10   :  { %1126 = vmatprep.subr.mxu1 %v1220_v9  ;;  %v1413_v32 = vld [vmem:[%s1830_s3 + $0xe0] sm:$0xff]  ;;  %v1425_v34 = vld [vmem:[%s1830_s3 + $0xd8] sm:$0xff]  ;;  %v1437_v36 = vld [vmem:[%s1830_s3 + $0xd0] sm:$0xff] }
  0x11   :  { %1127 = vmatpush3.msra.mxu1 %v97_v16  ;;  %v1443_v37 = vld [vmem:[%s1830_s3 + $0x148] sm:$0xff]  ;;  %v1455_v39 = vld [vmem:[%s1830_s3 + $0x140] sm:$0xff]  ;;  %v1467_v41 = vld [vmem:[%s1830_s3 + $0x138] sm:$0xff] }
  0x12   :  { %1128 = vmatprep.subr.mxu1 %v1220_v9  ;;  %v1449_v38 = vld [vmem:[%s1830_s3 + $0xc8] sm:$0xff]  ;;  %v1461_v40 = vld [vmem:[%s1830_s3 + $0xc0] sm:$0xff]  ;;  %v1473_v42 = vld [vmem:[%s1830_s3 + $0xb8] sm:$0xff] }
  0x13   :  { %1129 = vmatpush3.msra.mxu1 %v96_v17  ;;  %v1479_v43 = vld [vmem:[%s1830_s3 + $0x130] sm:$0xff]  ;;  %v1491_v45 = vld [vmem:[%s1830_s3 + $0x128] sm:$0xff]  ;;  %v1503_v47 = vld [vmem:[%s1830_s3 + $0x120] sm:$0xff] }
  0x14   :  { %1130 = vmatprep.subr.mxu1 %v1220_v9  ;;  %v1485_v44 = vld [vmem:[%s1830_s3 + $0xb0] sm:$0xff]  ;;  %v1497_v46 = vld [vmem:[%s1830_s3 + $0xa8] sm:$0xff]  ;;  %v1511_v48 = vld [vmem:[%s1830_s3 + $0xa0] sm:$0xff] }
  0x15   :  { %1131 = vmatpush3.msra.mxu1 %v95_v18  ;;  %v1517_v49 = vld [vmem:[%s1830_s3 + $0x118] sm:$0xff]  ;;  %v91_v50 = vld [vmem:[%s1830_s3 + $0x1a8] sm:$0xff]  ;;  %v1533_v52 = vld [vmem:[%s1830_s3 + $0x110] sm:$0xff] }
  0x16   :  { %1132 = vmatprep.subr.mxu1 %v1220_v9  ;;  %v1526_v51 = vld [vmem:[%s1830_s3 + $0x98] sm:$0xff]  ;;  %v90_v53 = vld [vmem:[%s1830_s3 + $0x1a0] sm:$0xff]  ;;  %v1542_v54 = vld [vmem:[%s1830_s3 + $0x90] sm:$0xff] }
  0x17   :  { %1133 = vmatpush3.msra.mxu1 %v94_v19  ;;  %v1549_v55 = vld [vmem:[%s1830_s3 + $0x108] sm:$0xff]  ;;  %v89_v56 = vld [vmem:[%s1830_s3 + $0x198] sm:$0xff]  ;;  %v1565_v58 = vld [vmem:[%s1830_s3 + $0x100] sm:$0xff] }
  0x18   :  { %1134 = vmatprep.subr.mxu1 %v1220_v9  ;;  %v1558_v57 = vld [vmem:[%s1830_s3 + $0x88] sm:$0xff]  ;;  %v88_v59 = vld [vmem:[%s1830_s3 + $0x190] sm:$0xff]  ;;  %v1574_v60 = vld [vmem:[%s1830_s3 + $0x80] sm:$0xff] }
  0x19   :  { %1135 = vmatpush3.msra.mxu1 %v93_v20  ;;  %v87_v61 = vld [vmem:[%s1830_s3 + $0x188] sm:$0xff]  ;;  %v86_v62 = vld [vmem:[%s1830_s3 + $0x180] sm:$0xff]  ;;  %v53_v14 = vld [vmem:[%s1830_s3 + $0x78] sm:$0xff] }
  0x1a   :  { %1136 = vmatprep.subr.mxu1 %v1220_v9  ;;  %v52_v16 = vld [vmem:[%s1830_s3 + $0x70] sm:$0xff]  ;;  %v51_v18 = vld [vmem:[%s1830_s3 + $0x68] sm:$0xff]  ;;  %v50_v19 = vld [vmem:[%s1830_s3 + $0x60] sm:$0xff] }
  0x1b   :  { %1137 = vmatpush3.msra.mxu1 %v92_v21  ;;  %v49_v20 = vld [vmem:[%s1830_s3 + $0x58] sm:$0xff]  ;;  %v48_v21 = vld [vmem:[%s1830_s3 + $0x50] sm:$0xff] }
  0x1c   :  { %1138 = vmatprep.subr.mxu1 %v1220_v9 }
  0x1d   :  { %1139 = vmatpush3.msra.mxu1 %v91_v50 }
  0x1e   :  { %1140 = vmatprep.subr.mxu1 %v1220_v9 }
  0x1f   :  { %1141 = vmatpush3.msra.mxu1 %v90_v53  ;;  %v857_v53 = vld [vmem:[%s1834_s7 + $0x78] sm:$0xff] }
  0x20   :  { %1142 = vmatprep.subr.mxu1 %v1220_v9 }
  0x21   :  { %1143 = vmatpush3.msra.mxu1 %v89_v56  ;;  %v871_v56 = vld [vmem:[%s1834_s7 + $0xe8] sm:$0xff] }
  0x22   :  { %1144 = vmatprep.subr.mxu1 %v1220_v9 }
  0x23   :  { %1145 = vmatpush3.msra.mxu1 %v88_v59 }
  0x24   :  { %1146 = vmatprep.subr.mxu1 %v1220_v9 }
  0x25   :  { %1147 = vmatpush3.msra.mxu1 %v87_v61 }
  0x26   :  { %1148 = vmatprep.subr.mxu1 %v1220_v9 }
  0x27   :  { %1149 = vmatpush3.msra.mxu1 %v86_v62  ;;  %v869_v62 = vld [vmem:[%s1834_s7 + $0xd8] sm:$0xff] }
  0x28   :  { %1153 = vmatprep.subr.mxu1 %v1220_v9 }
  0x74   :  { %v206_v22 = vpop.permute.xlu0 %205  ;;  %v363_v24 = vpop.permute.xlu1 %362 }
  0x75   :  { %971 = vmatmul.mubr.msk.f32.vlgmr.msra.gmra.mxu0 %vm207_vm2, %v206_v22  ;;  %v47_v22 = vld [vmem:[%s1830_s3 + $0x48] sm:$0xff] }
  0x76   :  { %317 = vmatpush1.msra.mxu0 %v1288_v3  ;;  %352 = vmatprep.mubr.f32.mxu0 %v1220_v9 }
  0x77   :  { %318 = vmatprep.subr.mxu0 %v1293_v4 }
  0x78   :  { %v285_v23 = vpop.permute.xlu0 %284  ;;  %319 = vmatpush1.msra.mxu0 %v1298_v5 }
  0x79   :  { %972 = vmatmul.mubr.msk.f32.vlgmr.msra.gmra.mxu0 %vm207_vm2, %v285_v23  ;;  %973 = vmatprep.subr.msk.mxu0 %vm108_vm0, %v1282_v1  ;;  %v46_v23 = vld [vmem:[%s1830_s3 + $0x40] sm:$0xff] }
  0x7a   :  { %974 = vmatpush1.msk.msra.mxu0 %vm108_vm0, %v1288_v3  ;;  %434 = vmatprep.mubr.f32.mxu0 %v1220_v9  ;;  %v1592_v3 = vld [vmem:[%s1829_s2] ss:$0 sm:$0xff] }
  0x7b   :  { %400 = vmatprep.subr.mxu0 %v1293_v4 }
  0x7c   :  { %401 = vmatpush1.msra.mxu0 %v1298_v5 }
  0x7d   :  { %975 = vmatmul.mubr.msk.f32.vlgmr.msra.gmra.mxu0 %vm117_vm1, %v363_v24  ;;  %979 = vmatprep.subr.mxu0 %v1370_v25  ;;  %v45_v24 = vld [vmem:[%s1830_s3 + $0x38] sm:$0xff] }
  0x7e   :  { %980 = vmatpush3.msra.mxu0 %v1376_v26 }
  0x7f   :  { %981 = vmatprep.subr.mxu0 %v1382_v27 }
  0x80   :  { %982 = vmatpush3.msra.mxu0 %v1389_v28 }
  0x81   :  { %983 = vmatprep.subr.mxu0 %v1395_v29 }
  0x82   :  { %984 = vmatpush3.msra.mxu0 %v1401_v30 }
  0x83   :  { %985 = vmatprep.subr.mxu0 %v1407_v31 }
  0x84   :  { %986 = vmatpush3.msra.mxu0 %v1413_v32 }
  0x85   :  { %987 = vmatprep.subr.mxu0 %v1419_v33 }
  0x86   :  { %988 = vmatpush3.msra.mxu0 %v1425_v34 }
  0x87   :  { %989 = vmatprep.subr.mxu0 %v1431_v35 }
  0x88   :  { %990 = vmatpush3.msra.mxu0 %v1437_v36 }
  0x89   :  { %991 = vmatprep.subr.mxu0 %v1443_v37 }
  0x8a   :  { %992 = vmatpush3.msra.mxu0 %v1449_v38 }
  0x8b   :  { %993 = vmatprep.subr.mxu0 %v1455_v39 }
  0x8c   :  { %994 = vmatpush3.msra.mxu0 %v1461_v40 }
  0x8d   :  { %995 = vmatprep.subr.mxu0 %v1467_v41 }
  0x8e   :  { %996 = vmatpush3.msra.mxu0 %v1473_v42 }
  0x8f   :  { %997 = vmatprep.subr.mxu0 %v1479_v43 }
  0x90   :  { %998 = vmatpush3.msra.mxu0 %v1485_v44 }
  0x91   :  { %999 = vmatprep.subr.mxu0 %v1491_v45 }
  0x92   :  { %1000 = vmatpush3.msra.mxu0 %v1497_v46 }
  0x93   :  { %1001 = vmatprep.subr.mxu0 %v1503_v47 }
  0x94   :  { %1002 = vmatpush3.msra.mxu0 %v1511_v48 }
  0x95   :  { %1003 = vmatprep.subr.mxu0 %v1517_v49 }
  0x96   :  { %1004 = vmatpush3.msra.mxu0 %v1526_v51 }
  0x97   :  { %1005 = vmatprep.subr.mxu0 %v1533_v52 }
  0x98   :  { %1006 = vmatpush3.msra.mxu0 %v1542_v54 }
  0x99   :  { %1007 = vmatprep.subr.mxu0 %v1549_v55 }
  0x9a   :  { %1008 = vmatpush3.msra.mxu0 %v1558_v57 }
  0x9b   :  { %1009 = vmatprep.subr.mxu0 %v1565_v58 }
  0x9c   :  { %1010 = vmatpush3.msra.mxu0 %v1574_v60 }
  0x9d   :  { %1031 = vmatprep.subr.mxu0 %v1376_v26 }
  0xc8   :  { %v191_v63 = vpop.f32.mrf.mxu0 }
  0xca   :  { %v193_v0 = vpop.f32.mrf.mxu0 }
  0xcb   :  { %v196_v1 = vmax.f32 %v191_v63, %v193_v0  ;;  %v976_v63 = vld [vmem:[%s1831_s4] ss:$0 sm:$0xff]  ;;  %v853_v0 = vld [vmem:[%s1834_s7 + $0x58] sm:$0xff] }
  0xcd   :  { %v203_v6 = vadd.f32 %v1592_v3, %v196_v1 }
  0xcf   :  { %v204_v13 = vmax.f32 %v203_v6, 0.0  ;;  %v851_v6 = vld [vmem:[%s1834_s7 + $0x48] sm:$0xff] }
 0x135   :  { %v276_v2 = vpop.f32.mrf.mxu0 }
 0x137   :  { %v278_v4 = vpop.f32.mrf.mxu0 }
 0x138   :  { %v281_v5 = vmax.f32 %v276_v2, %v278_v4  ;;  %v868_v2 = vld [vmem:[%s1834_s7 + $0xd0] sm:$0xff] }
 0x139   :  { %v354_v7 = vpop.f32.mrf.mxu0 }
 0x13a   :  { %v1596_v8 = vadd.f32 %v1592_v3, %v281_v5  ;;  %v867_v5 = vld [vmem:[%s1834_s7 + $0xc8] sm:$0xff] }
 0x13b   :  { %v356_v10 = vpop.f32.mrf.mxu0 }
 0x13c   :  { %v283_v11 = vmax.f32 %v1596_v8, 0.0  ;;  %v359_v12 = vmax.f32 %v354_v7, %v356_v10  ;;  %v866_v7 = vld [vmem:[%s1834_s7 + $0xc0] sm:$0xff]  ;;  %v865_v10 = vld [vmem:[%s1834_s7 + $0xb8] sm:$0xff] }
 0x13d   :  { %v436_v26 = vpop.f32.mrf.mxu0  ;;  %v850_v8 = vld [vmem:[%s1834_s7 + $0x40] sm:$0xff] }
 0x13e   :  { %v360_v15 = vadd.f32 %v1592_v3, %v359_v12  ;;  %508 = vmatprep.mubr.f32.mxu0 %v283_v11  ;;  %v864_v12 = vld [vmem:[%s1834_s7 + $0xb0] sm:$0xff] }
 0x13f   :  { %509 = vmatmul.mubr.f32.vlgmr.msra.gmra.mxu0 %v204_v13  ;;  %v848_v13 = vld [vmem:[%s1834_s7 + $0x30] sm:$0xff] }
 0x140   :  { %v361_v17 = vmax.f32 %v360_v15, 0.0  ;;  %1032 = vmatpush3.msra.mxu0 %v53_v14  ;;  %v863_v14 = vld [vmem:[%s1834_s7 + $0xa8] sm:$0xff] }
 0x141   :  { %1033 = vmatprep.subr.mxu0 %v1389_v28  ;;  %v42_v28 = vld [vmem:[%s1830_s3 + $0x20] sm:$0xff]  ;;  %v847_v15 = vld [vmem:[%s1834_s7 + $0x28] sm:$0xff] }
 0x142   :  { %1034 = vmatpush3.msra.mxu0 %v52_v16  ;;  %1151 = vmatmul.mubr.f32.vlgmr.msra.gmra.mxu1 %v361_v17  ;;  %v862_v16 = vld [vmem:[%s1834_s7 + $0xa0] sm:$0xff] }
 0x143   :  { %1035 = vmatprep.subr.mxu0 %v1401_v30  ;;  %661 = vmatprep.mubr.f32.mxu0 %v361_v17  ;;  %v41_v30 = vld [vmem:[%s1830_s3 + $0x18] sm:$0xff]  ;;  %v846_v17 = vld [vmem:[%s1834_s7 + $0x20] sm:$0xff] }
 0x144   :  { %1154 = vmatpush3.msra.mxu1 %v1370_v25  ;;  %1036 = vmatpush3.msra.mxu0 %v51_v18  ;;  %v44_v25 = vld [vmem:[%s1830_s3 + $0x30] sm:$0xff] }
 0x145   :  { %1155 = vmatprep.subr.mxu1 %v1220_v9  ;;  %1037 = vmatprep.subr.mxu0 %v1413_v32  ;;  %v40_v32 = vld [vmem:[%s1830_s3 + $0x10] sm:$0xff] }
 0x146   :  { %1156 = vmatpush3.msra.mxu1 %v1382_v27  ;;  %1038 = vmatpush3.msra.mxu0 %v50_v19  ;;  %v43_v27 = vld [vmem:[%s1830_s3 + $0x28] sm:$0xff] }
 0x147   :  { %1157 = vmatprep.subr.mxu1 %v1220_v9  ;;  %1039 = vmatprep.subr.mxu0 %v1425_v34 }
 0x148   :  { %1158 = vmatpush3.msra.mxu1 %v1395_v29  ;;  %1040 = vmatpush3.msra.mxu0 %v49_v20  ;;  %v438_v29 = vpop.f32.mrf.mxu0 }
 0x149   :  { %1159 = vmatprep.subr.mxu1 %v1220_v9  ;;  %1041 = vmatprep.subr.mxu0 %v1437_v36 }
 0x14a   :  { %1160 = vmatpush3.msra.mxu1 %v1407_v31  ;;  %1042 = vmatpush3.msra.mxu0 %v48_v21  ;;  %v441_v31 = vmax.f32 %v436_v26, %v438_v29  ;;  %v860_v26 = vld [vmem:[%s1834_s7 + $0x90] sm:$0xff]  ;;  %v843_v29 = vld [vmem:[%s1834_s7 + $0x8] sm:$0xff] }
 0x14b   :  { %1161 = vmatprep.subr.mxu1 %v1220_v9  ;;  %1043 = vmatprep.subr.mxu0 %v1449_v38 }
 0x14c   :  { %1162 = vmatpush3.msra.mxu1 %v1419_v33  ;;  %1044 = vmatpush3.msra.mxu0 %v47_v22  ;;  %v39_v33 = vld [vmem:[%s1830_s3 + $0x8] sm:$0xff]  ;;  %v442_v34 = vadd.f32 %v1592_v3, %v441_v31  ;;  %v852_v3 = vld [vmem:[%s1834_s7 + $0x50] sm:$0xff]  ;;  %v842_v31 = vld [vmem:[%s1834_s7] sm:$0xff] }
 0x14d   :  { %1163 = vmatprep.subr.mxu1 %v1220_v9  ;;  %1045 = vmatprep.subr.mxu0 %v1461_v40 }
 0x14e   :  { %1164 = vmatpush3.msra.mxu1 %v1431_v35  ;;  %1046 = vmatpush3.msra.mxu0 %v46_v23  ;;  %v38_v35 = vld [vmem:[%s1830_s3] sm:$0xff]  ;;  %v443_v36 = vmax.f32 %v442_v34, 0.0  ;;  %s1223_s3 = smov 120  }
 0x14f   :  { %1165 = vmatprep.subr.mxu1 %v1220_v9  ;;  %1047 = vmatprep.subr.mxu0 %v1473_v42 }
 0x150   :  { %1166 = vmatpush3.msra.mxu1 %v1443_v37  ;;  %1048 = vmatpush3.msra.mxu0 %v45_v24  ;;  %v861_v24 = vld [vmem:[%s1834_s7 + $0x98] sm:$0xff] }
 0x151   :  { %1167 = vmatprep.subr.mxu1 %v1220_v9  ;;  %1049 = vmatprep.subr.mxu0 %v1485_v44  ;;  %v753_v44 = vld [vmem:[%s1832_s5 + $0x18] sm:$0xff] }
 0x152   :  { %1168 = vmatpush3.msra.mxu1 %v1455_v39  ;;  %1050 = vmatpush3.msra.mxu0 %v44_v25  ;;  %v845_v25 = vld [vmem:[%s1834_s7 + $0x18] sm:$0xff] }
 0x153   :  { %1169 = vmatprep.subr.mxu1 %v1220_v9  ;;  %1051 = vmatprep.subr.mxu0 %v1497_v46  ;;  %v750_v46 = vld [vmem:[%s1832_s5] sm:$0xff] }
 0x154   :  { %1170 = vmatpush3.msra.mxu1 %v1467_v41  ;;  %1052 = vmatpush3.msra.mxu0 %v43_v27  ;;  %v844_v27 = vld [vmem:[%s1834_s7 + $0x10] sm:$0xff] }
 0x155   :  { %1171 = vmatprep.subr.mxu1 %v1220_v9  ;;  %1053 = vmatprep.subr.mxu0 %v1511_v48 }
 0x156   :  { %1172 = vmatpush3.msra.mxu1 %v1479_v43  ;;  %1054 = vmatpush3.msra.mxu0 %v42_v28  ;;  %v859_v28 = vld [vmem:[%s1834_s7 + $0x88] sm:$0xff] }
 0x157   :  { %1173 = vmatprep.subr.mxu1 %v1220_v9  ;;  %1055 = vmatprep.subr.mxu0 %v1526_v51 }
 0x158   :  { %1174 = vmatpush3.msra.mxu1 %v1491_v45  ;;  %1056 = vmatpush3.msra.mxu0 %v41_v30  ;;  %v751_v45 = vld [vmem:[%s1832_s5 + $0x8] sm:$0xff]  ;;  %v858_v30 = vld [vmem:[%s1834_s7 + $0x80] sm:$0xff] }
 0x159   :  { %1175 = vmatprep.subr.mxu1 %v1220_v9  ;;  %1057 = vmatprep.subr.mxu0 %v1542_v54  ;;  %v872_v54 = vld [vmem:[%s1834_s7 + $0xf0] sm:$0xff] }
 0x15a   :  { %1176 = vmatpush3.msra.mxu1 %v1503_v47  ;;  %1058 = vmatpush3.msra.mxu0 %v40_v32  ;;  %v756_v32 = vlaneseq }
 0x15b   :  { %1177 = vmatprep.subr.mxu1 %v1220_v9  ;;  %1059 = vmatprep.subr.mxu0 %v1558_v57  ;;  %v855_v57 = vld [vmem:[%s1834_s7 + $0x68] sm:$0xff] }
 0x15c   :  { %1178 = vmatpush3.msra.mxu1 %v1517_v49  ;;  %1060 = vmatpush3.msra.mxu0 %v39_v33  ;;  %v757_v33 = vshrl.u32 %v756_v32, 7 }
 0x15d   :  { %1179 = vmatprep.subr.mxu1 %v1220_v9  ;;  %1061 = vmatprep.subr.mxu0 %v1574_v60  ;;  %v854_v60 = vld [vmem:[%s1834_s7 + $0x60] sm:$0xff] }
 0x15e   :  { %1180 = vmatpush3.msra.mxu1 %v1533_v52  ;;  %1062 = vmatpush3.msra.mxu0 %v38_v35  ;;  %v873_v52 = vld [vmem:[%s1834_s7 + $0xf8] sm:$0xff]  ;;  %v758_v34 = vsub.s32 0, %v757_v33  ;;  %v754_v35 = vld [vmem:[%s1833_s6] sm:$0x3] }
 0x15f   :  { %1181 = vmatprep.subr.mxu1 %v1220_v9  ;;  %662 = vmatmul.mubr.f32.vlgmr.msra.gmra.mxu0 %v283_v11  ;;  %v849_v11 = vld [vmem:[%s1834_s7 + $0x38] sm:$0xff] }
 0x160   :  { %1182 = vmatpush3.msra.mxu1 %v1549_v55  ;;  %1185 = vmatprep.mubr.msk.f32.mxu1 %vm1222_vm3, %v1220_v9  ;;  %v856_v55 = vld [vmem:[%s1834_s7 + $0x70] sm:$0xff] }
 0x161   :  { %1183 = vmatprep.subr.mxu1 %v1220_v9  ;;  %833 = vmatprep.mubr.f32.mxu0 %v1220_v9  ;;  %v752_v9 = vld [vmem:[%s1832_s5 + $0x10] sm:$0xff] }
 0x162   :  { %1184 = vmatpush3.msra.mxu1 %v1565_v58  ;;  %797 = vmatprep.subr.mxu0 %v753_v44  ;;  %v870_v58 = vld [vmem:[%s1834_s7 + $0xe0] sm:$0xff] }
 0x163   :  { %1186 = vmatmul.mubr.f32.vlgmr.msra.gmra.mxu1 %v443_v36  ;;  %798 = vmatpush1.msra.mxu0 %v752_v9  ;;  %v762_v36 = vsub.s32 1, %v757_v33 }
 0x164   :  { %799 = vmatprep.subr.mxu0 %v751_v45  ;;  %1083 = vmatprep.subr.mxu1 %v873_v52  ;;  %v978_v45 = vld [vmem:[%s1835_s8] ss:$0 sm:$0xff] }
 0x165   :  { %800 = vmatpush1.msra.mxu0 %v750_v46  ;;  %1084 = vmatpush3.msra.mxu1 %v857_v53 }
 0x166   :  { %1085 = vmatprep.subr.mxu1 %v872_v54 }
 0x167   :  { %1086 = vmatpush3.msra.mxu1 %v856_v55 }
 0x168   :  { %1087 = vmatprep.subr.mxu1 %v871_v56 }
 0x169   :  { %1088 = vmatpush3.msra.mxu1 %v855_v57 }
 0x16a   :  { %1089 = vmatprep.subr.mxu1 %v870_v58 }
 0x16b   :  { %1090 = vmatpush3.msra.mxu1 %v854_v60 }
 0x16c   :  { %1091 = vmatprep.subr.mxu1 %v869_v62 }
 0x16d   :  { %1092 = vmatpush3.msra.mxu1 %v853_v0 }
 0x16e   :  { %1093 = vmatprep.subr.mxu1 %v868_v2 }
 0x16f   :  { %1094 = vmatpush3.msra.mxu1 %v852_v3 }
 0x170   :  { %1095 = vmatprep.subr.mxu1 %v867_v5 }
 0x171   :  { %1096 = vmatpush3.msra.mxu1 %v851_v6 }
 0x172   :  { %1097 = vmatprep.subr.mxu1 %v866_v7 }
 0x173   :  { %1098 = vmatpush3.msra.mxu1 %v850_v8 }
 0x174   :  { %1099 = vmatprep.subr.mxu1 %v865_v10 }
 0x175   :  { %1100 = vmatpush3.msra.mxu1 %v849_v11 }
 0x176   :  { %1101 = vmatprep.subr.mxu1 %v864_v12 }
 0x177   :  { %1102 = vmatpush3.msra.mxu1 %v848_v13 }
 0x178   :  { %1103 = vmatprep.subr.mxu1 %v863_v14 }
 0x179   :  { %1104 = vmatpush3.msra.mxu1 %v847_v15 }
 0x17a   :  { %1105 = vmatprep.subr.mxu1 %v862_v16 }
 0x17b   :  { %1106 = vmatpush3.msra.mxu1 %v846_v17 }
 0x17c   :  { %1107 = vmatprep.subr.mxu1 %v861_v24 }
 0x17d   :  { %1108 = vmatpush3.msra.mxu1 %v845_v25 }
 0x17e   :  { %1109 = vmatprep.subr.mxu1 %v860_v26 }
 0x17f   :  { %1110 = vmatpush3.msra.mxu1 %v844_v27 }
 0x180   :  { %1111 = vmatprep.subr.mxu1 %v859_v28 }
 0x181   :  { %1112 = vmatpush3.msra.mxu1 %v843_v29 }
 0x182   :  { %1113 = vmatprep.subr.mxu1 %v858_v30 }
 0x183   :  { %1114 = vmatpush3.msra.mxu1 %v842_v31 }
 0x1ff   :  { %v1011_v37 = vpop.f32.mrf.mxu0 }
 0x201   :  { %v1012_v38 = vpop.f32.mrf.mxu0 }
 0x202   :  { %v1013_v39 = vadd.f32 %v1012_v38, %v1011_v37  ;;  %v580_v40 = vpop.f32.mrf.mxu1  ;;  %v759_v37 = vrot.slane %v754_v35, %v758_v34  ;;  %v763_v38 = vrot.slane %v754_v35, %v762_v36 }
 0x204   :  { %v1702_v41 = vadd.f32 %v1013_v39, %v580_v40  ;;  %v1152_v42 = vpop.f32.mrf.mxu1 }
 0x206   :  { %585 = vrot.lane.b32.xlu0 %v1702_v41, %s1223_s3 }
 0x21f   :  { %v1063_v43 = vpop.f32.mrf.mxu0 }
 0x221   :  { %v1064_v47 = vpop.f32.mrf.mxu0 }
 0x222   :  { %v1065_v48 = vadd.f32 %v1064_v47, %v1063_v43 }
 0x223   :  { %v733_v49 = vpop.f32.mrf.mxu1 }
 0x224   :  { %v734_v50 = vadd.f32 %v1065_v48, %v733_v49 }
 0x225   :  { %v1187_v51 = vpop.f32.mrf.mxu1 }
 0x226   :  { %738 = vrot.lane.b32.xlu1 %v734_v50, %s1223_s3  ;;  %s959_s3 = sshll.u32 %s1225_s11, 4  ;;  %s960_s3 = int_to_ptr.vmem [resolvable:$true] %s959_s3 }
 0x227   :  { %s1196_s6 = scalar_lea.vmem %s960_s3, 32  ;;  %p1201_p1 = scmp.lt.s32.totalorder %s960_s3, %s960_s3 }
 0x228   :  { %p1197_p0 = scmp.ne.s32.totalorder %s960_s3, %s1196_s6  ;;  %p1202_p2 = scmp.lt.s32.totalorder %s1196_s6, %s1196_s6 }
 0x22a   :  { %p1203_p3 = por %p1202_p2, %p1201_p1 }
 0x22c   :  { %p1204_p4 = pnand %p1203_p3, %p1197_p0 }
 0x278   :  { %v586_v18 = vpop.permute.xlu0 %585 }
 0x279   :  { %v588_v19 = vmax.f32 %v1702_v41, %v586_v18 }
 0x27b   :  { %v595_v20 = vadd.f32 %v976_v63, %v588_v19 }
 0x27d   :  { %v596_v21 = vmax.f32 %v595_v20, 0.0 }
 0x298   :  { %v739_v59 = vpop.permute.xlu1 %738 }
 0x299   :  { %v741_v61 = vmax.f32 %v734_v50, %v739_v59 }
 0x29b   :  { %v742_v1 = vadd.f32 %v976_v63, %v741_v61 }
 0x29d   :  { %v743_v4 = vmax.f32 %v742_v1, 0.0 }
 0x29f   :  { %745 = vrot.lane.b32.xlu1 %v743_v4, %s1224_s21 }
 0x311   :  { %v746_v22 = vpop.permute.xlu1 %745 }
 0x312   :  { %v749_v23 = vsel %vm748_vm4, %v596_v21, %v746_v22 }
 0x313   :  { %977 = vmatmul.mubr.msk.f32.vlgmr.msra.gmra.mxu0 %vm207_vm2, %v749_v23 }
 0x3d3   :  { %v835_v39 = vpop.f32.mrf.mxu0 }
 0x3d4   :  { %v836_v40 = vadd.f32 %v835_v39, %v759_v37 }
 0x3d5   :  { %v837_v41 = vpop.f32.mrf.mxu0 }
 0x3d6   :  { %v838_v42 = vadd.f32 %v837_v41, %v763_v38  ;;  %v840_v44 = vmax.f32 %v836_v40, 0.0 }
 0x3d8   :  { %v841_v43 = vmax.f32 %v838_v42, 0.0 }
 0x3da   :  { %945 = vmatprep.mubr.f32.mxu1 %v841_v43 }
 0x3db   :  { %946 = vmatmul.mubr.f32.vlgmr.msra.gmra.mxu1 %v840_v44 }
 0x49b   :  { %v1115_v9 = vpop.f32.mrf.mxu1 }
 0x49d   :  { %v1116_v46 = vpop.f32.mrf.mxu1 }
 0x49e   :  { %v1117_v47 = vadd.f32 %v1116_v46, %v1115_v9 }
 0x4a0   :  { %v948_v48 = vadd.f32 %v1117_v47, %v978_v45 }
 0x4a2   :  { %952 = vst.msk [vmem:[#allocation2] sm:$0x3] %vm951_vm5, %v948_v48 }
 0x4a3   :  { %1207 = shalt.err (!%p1204_p4)
}
 0x4a4   :  { %962 = dma.vmem_to_hbm [thread:$0]  %s960_s3, 32, %s1836_s9, [#allocation3]  }
 0x4a5   :  { %1216 = dma.done.wait [#allocation3], 32  }
 0x4a6   :  { %1217 = vsyncadd [#allocation3], 4294967264 }
 0x4a7   :  { %966 = vsyncpa [#allocation3], 1 }

</bundles_post_ra>
